<compile_context>
chip_gen: v7x
topology: tpu7x:2x2x1
jax: 0.10.0
libtpu: 0.0.40
codegen_flags: <defaults>
</compile_context>

<pallas_src>
import functools

import jax
import jax.numpy as jnp
from jax.experimental import pallas as pl
from jax.experimental.pallas import tpu as pltpu


def _round_up(v, m):
    return (v + m - 1) // m * m


def _mlp_encoder_kernel(x_ref, w1_ref, w2_ref, o_ref):
    # Biases are pre-folded into the padded weights, so the hot path is just:
    #   o = relu(relu(x @ W1) @ W2)
    # with f32 accumulation on the MXU.  The hidden activations are cast to the
    # weight/compute dtype explicitly before the second matmul (intended compute
    # dtype; no-op when compute dtype is f32).
    h = jnp.dot(x_ref[...], w1_ref[...], preferred_element_type=jnp.float32)
    h = jnp.maximum(h, 0.0).astype(w2_ref.dtype)
    o = jnp.dot(h, w2_ref[...], preferred_element_type=jnp.float32)
    o_ref[...] = jnp.maximum(o, 0.0).astype(o_ref.dtype)


@functools.partial(jax.jit, static_argnames=("tile_m", "compute_dtype"))
def mlp_encoder(x, w1, b1, w2, b2, *, tile_m=512, compute_dtype=None):
    """relu(relu(x @ w1 + b1) @ w2 + b2), MXU-friendly padded & tiled over rows.

    x:  (N, c_in)          node features
    w1: (c_in, hidden)     fc1 weight (transposed vs torch), b1: (hidden,)
    w2: (hidden, c_out)    fc2 weight (transposed vs torch), b2: (c_out,)
    compute_dtype: MXU operand dtype (e.g. jnp.bfloat16 on v6e/v7x); f32 accum.
    """
    n, c_in = x.shape
    hidden = w1.shape[1]
    c_out = w2.shape[1]
    out_dtype = x.dtype
    compute_dtype = compute_dtype or x.dtype

    # ---- static padded geometry (lane-dense, bias-fold column included) ----
    sub = 16 if jnp.dtype(compute_dtype) == jnp.dtype(jnp.bfloat16) else 8
    k1_pad = _round_up(c_in + 1, 128)     # +1: ones column carrying b1 fold
    h_pad = _round_up(hidden + 1, 128)    # +1: ones column carrying b2 fold
    c_out_pad = _round_up(c_out, 128)

    cbytes = jnp.dtype(compute_dtype).itemsize
    obytes = jnp.dtype(out_dtype).itemsize

    # Effective row tile: multiple of the sublane tile, no larger than the
    # (padded) problem, and shrunk to stay inside a conservative VMEM budget
    # (safe on v7x's 64 MiB VMEM / 32 MiB default scoped limit).
    tm = min(_round_up(tile_m, sub), _round_up(n, sub))

    def _vmem_est(tm_):
        return (2 * tm_ * k1_pad * cbytes          # x tile (double-buffered)
                + 2 * tm_ * c_out_pad * obytes     # out tile (double-buffered)
                + 2 * (k1_pad * h_pad + h_pad * c_out_pad) * cbytes  # weights
                + tm_ * h_pad * 4)                 # f32 hidden activations

    vmem_budget = 28 * 1024 * 1024
    while _vmem_est(tm) > vmem_budget and tm > sub:
        tm = max(sub, _round_up(tm // 2, sub))

    n_pad = _round_up(n, tm)
    grid = (n_pad // tm,)

    # ---- build padded operands (bias folded into weights) ----
    x_pad = jnp.zeros((n_pad, k1_pad), compute_dtype)
    x_pad = x_pad.at[:n, :c_in].set(x.astype(compute_dtype))
    x_pad = x_pad.at[:, c_in].set(jnp.asarray(1.0, compute_dtype))

    w1_pad = jnp.zeros((k1_pad, h_pad), compute_dtype)
    w1_pad = w1_pad.at[:c_in, :hidden].set(w1.astype(compute_dtype))
    w1_pad = w1_pad.at[c_in, :hidden].set(b1.reshape(-1).astype(compute_dtype))
    w1_pad = w1_pad.at[c_in, hidden].set(jnp.asarray(1.0, compute_dtype))

    w2_pad = jnp.zeros((h_pad, c_out_pad), compute_dtype)
    w2_pad = w2_pad.at[:hidden, :c_out].set(w2.astype(compute_dtype))
    w2_pad = w2_pad.at[hidden, :c_out].set(b2.reshape(-1).astype(compute_dtype))

    # ---- compiler params & cost hint ----
    cp_kwargs = {"dimension_semantics": ("parallel",)}
    est = _vmem_est(tm)
    if est > 24 * 1024 * 1024:
        cp_kwargs["vmem_limit_bytes"] = int(min(60 * 1024 * 1024, 2 * est))
    compiler_params = pltpu.CompilerParams(**cp_kwargs)

    cost_estimate = pl.CostEstimate(
        flops=2 * n_pad * (k1_pad * h_pad + h_pad * c_out_pad),
        transcendentals=0,
        bytes_accessed=(x_pad.size * cbytes + w1_pad.size * cbytes
                        + w2_pad.size * cbytes + n_pad * c_out_pad * obytes),
    )

    out_pad = pl.pallas_call(
        _mlp_encoder_kernel,
        out_shape=jax.ShapeDtypeStruct((n_pad, c_out_pad), out_dtype),
        grid_spec=pltpu.PrefetchScalarGridSpec(
            num_scalar_prefetch=0,
            grid=grid,
            in_specs=[
                pl.BlockSpec((tm, k1_pad), lambda i: (i, 0)),        # x row tile
                pl.BlockSpec((k1_pad, h_pad), lambda i: (0, 0)),     # W1 (resident)
                pl.BlockSpec((h_pad, c_out_pad), lambda i: (0, 0)),  # W2 (resident)
            ],
            out_specs=pl.BlockSpec((tm, c_out_pad), lambda i: (i, 0)),
        ),
        compiler_params=compiler_params,
        cost_estimate=cost_estimate,
    )(x_pad, w1_pad, w2_pad)

    return out_pad[:n, :c_out]


def init_params(key, in_channels, out_channels, dtype=jnp.float32):
    """Deterministic synthetic init matching nn.Linear shapes (weights transposed)."""
    hidden = 2 * out_channels
    k1, k2, k3, k4 = jax.random.split(key, 4)
    s1 = 1.0 / jnp.sqrt(in_channels)
    s2 = 1.0 / jnp.sqrt(hidden)
    w1 = jax.random.uniform(k1, (in_channels, hidden), dtype, -s1, s1)
    b1 = jax.random.uniform(k2, (hidden,), dtype, -s1, s1)
    w2 = jax.random.uniform(k3, (hidden, out_channels), dtype, -s2, s2)
    b2 = jax.random.uniform(k4, (out_channels,), dtype, -s2, s2)
    return w1, b1, w2, b2


if __name__ == "__main__":
    key = jax.random.PRNGKey(0)
    kx, kp, ke = jax.random.split(key, 3)

    N = 8          # number of nodes (rows)
    IN_CH = 16     # in_channels
    OUT_CH = 32    # out_channels -> hidden = 64

    x = jax.random.normal(kx, (N, IN_CH), jnp.float32)
    # edge_index is accepted by the torch forward but never used.
    edge_index = jax.random.randint(ke, (2, 16), 0, N, dtype=jnp.int32)

    w1, b1, w2, b2 = init_params(kp, IN_CH, OUT_CH)

    # f32 path (v5e-friendly epilogue, exact vs reference)
    out = jax.block_until_ready(mlp_encoder(x, w1, b1, w2, b2))
    ref = jnp.maximum(jnp.maximum(x @ w1 + b1, 0.0) @ w2 + b2, 0.0)
    assert out.shape == (N, OUT_CH)
    assert jnp.allclose(out, ref, atol=1e-5, rtol=1e-5)

    # bf16-operand path (v6e/v7x MXU), f32 accumulation kept inside the kernel
    out_bf16 = jax.block_until_ready(
        mlp_encoder(x, w1, b1, w2, b2, compute_dtype=jnp.bfloat16))
    assert out_bf16.shape == (N, OUT_CH)
    assert jnp.allclose(out_bf16.astype(jnp.float32), ref, atol=6e-2, rtol=6e-2)

    print("KERNEL_OK")
</pallas_src>

<mosaic_0001>
module attributes {stable_mosaic.version = 11 : i64} {
  func.func @_mlp_encoder_kernel(%arg0: i32, %arg1: memref<8x128xf32, #tpu.memory_space<vmem>>, %arg2: memref<128x128xf32, #tpu.memory_space<vmem>>, %arg3: memref<128x128xf32, #tpu.memory_space<vmem>>, %arg4: memref<8x128xf32, #tpu.memory_space<vmem>>) attributes {dimension_semantics = [#tpu.dimension_semantics<parallel>], iteration_bounds = array<i64: 1>, scalar_prefetch = 0 : i64, scratch_operands = 0 : i64, tpu.core_type = #tpu.core_type<tc>, window_params = [{transform_indices = @transform_0, window_bounds = array<i64: 8, 128>}, {pipeline_mode = #tpu.pipeline_mode<synchronous>, transform_indices = @transform_1, window_bounds = array<i64: 128, 128>}, {pipeline_mode = #tpu.pipeline_mode<synchronous>, transform_indices = @transform_2, window_bounds = array<i64: 128, 128>}, {transform_indices = @transform_3, window_bounds = array<i64: 8, 128>}]} {
    %c0 = arith.constant 0 : index
    %c0_0 = arith.constant 0 : index
    %0 = vector.load %arg1[%c0, %c0_0] : memref<8x128xf32, #tpu.memory_space<vmem>>, vector<8x128xf32>
    %c0_1 = arith.constant 0 : index
    %c0_2 = arith.constant 0 : index
    %1 = vector.load %arg2[%c0_1, %c0_2] : memref<128x128xf32, #tpu.memory_space<vmem>>, vector<128x128xf32>
    %cst = arith.constant dense<0.000000e+00> : vector<8x128xf32>
    %2 = tpu.matmul %0, %1, %cst {dimension_numbers = #tpu.dot_dimension_numbers<[1], [0], [0], [1], [0, 0, 1, 1], [], []>} : vector<8x128xf32>, vector<128x128xf32>, vector<8x128xf32> -> vector<8x128xf32>
    %cst_3 = arith.constant 0.000000e+00 : f32
    %3 = vector.broadcast %cst_3 : f32 to vector<8x128xf32>
    %4 = arith.maximumf %2, %3 : vector<8x128xf32>
    %c0_4 = arith.constant 0 : index
    %c0_5 = arith.constant 0 : index
    %5 = vector.load %arg3[%c0_4, %c0_5] : memref<128x128xf32, #tpu.memory_space<vmem>>, vector<128x128xf32>
    %cst_6 = arith.constant dense<0.000000e+00> : vector<8x128xf32>
    %6 = tpu.matmul %4, %5, %cst_6 {dimension_numbers = #tpu.dot_dimension_numbers<[1], [0], [0], [1], [0, 0, 1, 1], [], []>} : vector<8x128xf32>, vector<128x128xf32>, vector<8x128xf32> -> vector<8x128xf32>
    %cst_7 = arith.constant 0.000000e+00 : f32
    %7 = vector.broadcast %cst_7 : f32 to vector<8x128xf32>
    %8 = arith.maximumf %6, %7 : vector<8x128xf32>
    %c0_8 = arith.constant 0 : index
    %c0_9 = arith.constant 0 : index
    %9 = vector.load %arg4[%c0_8, %c0_9] : memref<8x128xf32, #tpu.memory_space<vmem>>, vector<8x128xf32>
    tpu.vector_store %arg4[%c0_8, %c0_9], %8 {strides = array<i32>} : memref<8x128xf32, #tpu.memory_space<vmem>>, vector<8x128xf32>,
    return
  }
  func.func @transform_0(%arg0: i32) -> (i32, i32) {
    %c0_i32 = arith.constant 0 : i32
    %c0_i32_0 = arith.constant 0 : i32
    return %arg0, %c0_i32 : i32, i32
  }
  func.func @transform_1(%arg0: i32) -> (i32, i32) {
    %c0_i32 = arith.constant 0 : i32
    %c0_i32_0 = arith.constant 0 : i32
    %c0_i32_1 = arith.constant 0 : i32
    return %c0_i32, %c0_i32_0 : i32, i32
  }
  func.func @transform_2(%arg0: i32) -> (i32, i32) {
    %c0_i32 = arith.constant 0 : i32
    %c0_i32_0 = arith.constant 0 : i32
    %c0_i32_1 = arith.constant 0 : i32
    return %c0_i32, %c0_i32_0 : i32, i32
  }
  func.func @transform_3(%arg0: i32) -> (i32, i32) {
    %c0_i32 = arith.constant 0 : i32
    %c0_i32_0 = arith.constant 0 : i32
    return %arg0, %c0_i32 : i32, i32
  }
}

</mosaic_0001>

<bundles_post_ra>
// kernel: mlp_encoder.1
= control target key start
LH: loop header
LB: loop body
LE: loop exit
PB: predicated region body
PF: predicated region fallthrough
CT: control target
= control target key end

     0   :  { %v385_v3 = vmov 0.0|0.0   ;;  %vm386_vm0 = vmmov 0   ;;  %v387_v6 = vmov 0.0   ;;  %s536_s0 = inlined_call_operand.vmem [shape: f32[8,128], index: 0, kind: input, shape index: {}]   ;;  %s537_s1 = inlined_call_operand.vmem [shape: f32[128,128], index: 1, kind: input, shape index: {}]   ;;  %s538_s2 = inlined_call_operand.vmem [shape: f32[128,128], index: 2, kind: input, shape index: {}]   ;;  %s539_s3 = inlined_call_operand.hbm [shape: f32[8,128], index: 3, kind: output, shape index: {}]  }
   0x1   :  { %v16_v0 = vld [vmem:[%s537_s1] sm:$0xff]  ;;  %v17_v1 = vld [vmem:[%s537_s1 + $0x8] sm:$0xff]  ;;  %v18_v2 = vld [vmem:[%s537_s1 + $0x10] sm:$0xff]  ;;  %309 = vmatprep.subr.bf16.mxu0 %v385_v3  ;;  %271 = vmatprep.mubr.msk.f32.mxu0 %vm386_vm0, %v387_v6 }
   0x2   :  { %v310_v4 = vpack.c.bf16 %v17_v1, %v16_v0  ;;  %v19_v5 = vld [vmem:[%s537_s1 + $0x18] sm:$0xff]  ;;  %333 = vmatprep.subr.bf16.mxu1 %v385_v3  ;;  %306 = vmatprep.mubr.msk.f32.mxu1 %vm386_vm0, %v387_v6  ;;  %v20_v8 = vld [vmem:[%s537_s1 + $0x20] sm:$0xff]  ;;  %v21_v9 = vld [vmem:[%s537_s1 + $0x28] sm:$0xff] }
   0x3   :  { %v313_v7 = vpack.c.bf16 %v19_v5, %v18_v2  ;;  %v103_v10 = vld [vmem:[%s538_s2] sm:$0xff]  ;;  %v104_v11 = vld [vmem:[%s538_s2 + $0x8] sm:$0xff]  ;;  %v105_v12 = vld [vmem:[%s538_s2 + $0x10] sm:$0xff]  ;;  %v316_v14 = vpack.c.bf16 %v21_v9, %v20_v8 }
   0x4   :  { %311 = vmatpush3.bf16.msra.mxu0 %v310_v4  ;;  %v106_v13 = vld [vmem:[%s538_s2 + $0x18] sm:$0xff]  ;;  %v334_v15 = vpack.c.bf16 %v104_v11, %v103_v10  ;;  %v22_v16 = vld [vmem:[%s537_s1 + $0x30] sm:$0xff]  ;;  %v107_v19 = vld [vmem:[%s538_s2 + $0x20] sm:$0xff] }
   0x5   :  { %312 = vmatprep.subr.bf16.mxu0 %v385_v3  ;;  %v23_v17 = vld [vmem:[%s537_s1 + $0x38] sm:$0xff]  ;;  %v337_v18 = vpack.c.bf16 %v106_v13, %v105_v12  ;;  %v108_v20 = vld [vmem:[%s538_s2 + $0x28] sm:$0xff] }
   0x6   :  { %335 = vmatpush3.bf16.msra.mxu1 %v334_v15 }
   0x7   :  { %336 = vmatprep.subr.bf16.mxu1 %v385_v3 }
   0x8   :  { %314 = vmatpush3.bf16.msra.mxu0 %v313_v7 }
   0x9   :  { %315 = vmatprep.subr.bf16.mxu0 %v385_v3 }
   0xa   :  { %8 = vsyncpa [#allocation3], 0  ;;  %v319_v21 = vpack.c.bf16 %v23_v17, %v22_v16  ;;  %v24_v22 = vld [vmem:[%s537_s1 + $0x40] sm:$0xff]  ;;  %v25_v23 = vld [vmem:[%s537_s1 + $0x48] sm:$0xff]  ;;  %338 = vmatpush3.bf16.msra.mxu1 %v337_v18  ;;  %v340_v24 = vpack.c.bf16 %v108_v20, %v107_v19  ;;  %s388_s23 = smov [#allocation2]  }
   0xb   :  { %339 = vmatprep.subr.bf16.mxu1 %v385_v3  ;;  %v109_v25 = vld [vmem:[%s538_s2 + $0x30] sm:$0xff]  ;;  %v110_v26 = vld [vmem:[%s538_s2 + $0x38] sm:$0xff]  ;;  %v322_v27 = vpack.c.bf16 %v25_v23, %v24_v22  ;;  %v111_v31 = vld [vmem:[%s538_s2 + $0x40] sm:$0xff] }
   0xc   :  { %317 = vmatpush3.bf16.msra.mxu0 %v316_v14  ;;  %v26_v28 = vld [vmem:[%s537_s1 + $0x50] sm:$0xff]  ;;  %v27_v29 = vld [vmem:[%s537_s1 + $0x58] sm:$0xff]  ;;  %v343_v30 = vpack.c.bf16 %v110_v26, %v109_v25  ;;  %v112_v32 = vld [vmem:[%s538_s2 + $0x48] sm:$0xff] }
   0xd   :  { %318 = vmatprep.subr.bf16.mxu0 %v385_v3  ;;  %v325_v33 = vpack.c.bf16 %v27_v29, %v26_v28  ;;  %v28_v34 = vld [vmem:[%s537_s1 + $0x60] sm:$0xff]  ;;  %v29_v35 = vld [vmem:[%s537_s1 + $0x68] sm:$0xff]  ;;  %v346_v36 = vpack.c.bf16 %v112_v32, %v111_v31  ;;  %v113_v37 = vld [vmem:[%s538_s2 + $0x50] sm:$0xff] }
   0xe   :  { %341 = vmatpush3.bf16.msra.mxu1 %v340_v24  ;;  %v114_v38 = vld [vmem:[%s538_s2 + $0x58] sm:$0xff]  ;;  %v328_v39 = vpack.c.bf16 %v29_v35, %v28_v34  ;;  %v30_v40 = vld [vmem:[%s537_s1 + $0x70] sm:$0xff]  ;;  %v115_v43 = vld [vmem:[%s538_s2 + $0x60] sm:$0xff] }
   0xf   :  { %342 = vmatprep.subr.bf16.mxu1 %v385_v3  ;;  %v31_v41 = vld [vmem:[%s537_s1 + $0x78] sm:$0xff]  ;;  %v349_v42 = vpack.c.bf16 %v114_v38, %v113_v37  ;;  %v116_v44 = vld [vmem:[%s538_s2 + $0x68] sm:$0xff]  ;;  %v15_v47 = vld [vmem:[%s536_s0] sm:$0xff]  ;;  %s197_s0 = sshll.u32 %s388_s23, 4  ;;  %s198_s0 = int_to_ptr.vmem [resolvable:$true] %s197_s0 }
  0x10   :  { %320 = vmatpush3.bf16.msra.mxu0 %v319_v21  ;;  %v331_v45 = vpack.c.bf16 %v31_v41, %v30_v40  ;;  %v352_v46 = vpack.c.bf16 %v116_v44, %v115_v43  ;;  %v117_v48 = vld [vmem:[%s538_s2 + $0x70] sm:$0xff]  ;;  %v118_v49 = vld [vmem:[%s538_s2 + $0x78] sm:$0xff]  ;;  %s361_s24 = scalar_lea.vmem %s198_s0, 128  ;;  %p366_p1 = scmp.lt.s32.totalorder %s198_s0, %s198_s0 }
  0x11   :  { %321 = vmatprep.subr.bf16.mxu0 %v385_v3  ;;  %v355_v50 = vpack.c.bf16 %v118_v49, %v117_v48  ;;  %p362_p0 = scmp.ne.s32.totalorder %s198_s0, %s361_s24  ;;  %p367_p2 = scmp.lt.s32.totalorder %s361_s24, %s361_s24 }
  0x12   :  { %344 = vmatpush3.bf16.msra.mxu1 %v343_v30 }
  0x13   :  { %345 = vmatprep.subr.bf16.mxu1 %v385_v3  ;;  %p368_p3 = por %p367_p2, %p366_p1 }
  0x14   :  { %323 = vmatpush3.bf16.msra.mxu0 %v322_v27 }
  0x15   :  { %324 = vmatprep.subr.bf16.mxu0 %v385_v3  ;;  %p369_p4 = pnand %p368_p3, %p362_p0 }
  0x16   :  { %347 = vmatpush3.bf16.msra.mxu1 %v346_v36 }
  0x17   :  { %348 = vmatprep.subr.bf16.mxu1 %v385_v3 }
  0x18   :  { %326 = vmatpush3.bf16.msra.mxu0 %v325_v33 }
  0x19   :  { %327 = vmatprep.subr.bf16.mxu0 %v385_v3 }
  0x1a   :  { %350 = vmatpush3.bf16.msra.mxu1 %v349_v42 }
  0x1b   :  { %351 = vmatprep.subr.bf16.mxu1 %v385_v3 }
  0x1c   :  { %329 = vmatpush3.bf16.msra.mxu0 %v328_v39 }
  0x1d   :  { %330 = vmatprep.subr.bf16.mxu0 %v385_v3 }
  0x1e   :  { %353 = vmatpush3.bf16.msra.mxu1 %v352_v46 }
  0x1f   :  { %354 = vmatprep.subr.bf16.mxu1 %v385_v3 }
  0x20   :  { %332 = vmatpush3.bf16.msra.mxu0 %v331_v45 }
  0x22   :  { %356 = vmatpush3.bf16.msra.mxu1 %v355_v50 }
  0x23   :  { %272 = vmatmul.mubr.f32.vlgmr.msra.gmra.mrb[0].mxu0 %v15_v47 }
  0xf6   :  { %v98_v51 = vpop.f32.mrb[0].mxu0 }
  0xf7   :  { %v102_v52 = vmax.f32 %v98_v51, 0.0  ;;  %v273_v53 = vpop.f32.mrb[1].mxu0 }
  0xf9   :  { %307 = vmatmul.mubr.f32.vlgmr.msra.gmra.mrb[0].mxu1 %v102_v52 }
 0x1cc   :  { %v185_v54 = vpop.f32.mrb[0].mxu1 }
 0x1cd   :  { %v189_v55 = vmax.f32 %v185_v54, 0.0  ;;  %v308_v56 = vpop.f32.mrb[1].mxu1 }
 0x1cf   :  { %190 = vst [vmem:[#allocation2] sm:$0xff] %v189_v55 }
 0x1d0   :  { %372 = shalt.err (!%p369_p4)
}
 0x1d1   :  { %s373_s26 = scalar_lea.hbm %s539_s3, 128 }
 0x1d2   :  { %p374_p5 = scmp.ne.s32.totalorder %s539_s3, %s373_s26  ;;  %p377_p6 = scmp.lt.u32.totalorder %s373_s26, %s539_s3 }
 0x1d4   :  { %p379_p7 = pnand %p377_p6, %p374_p5 }
 0x1d6   :  { %382 = shalt.err (!%p379_p7)
}
 0x1d7   :  { %200 = dma.vmem_to_hbm [thread:$0]  %s198_s0, 128, %s539_s3, [#allocation3]  }
 0x1d8   :  { %383 = dma.done.wait [#allocation3], 128  }
 0x1d9   :  { %384 = vsyncadd [#allocation3], 4294967168 }
 0x1da   :  { %204 = vsyncpa [#allocation3], 1 }

</bundles_post_ra>
